<compile_context>
chip_gen: v7x
topology: tpu7x:2x2x1
jax: 0.10.0
libtpu: 0.0.40
codegen_flags: <defaults>
</compile_context>

<pallas_src>
import functools

import jax
import jax.numpy as jnp
from jax.experimental import pallas as pl
from jax.experimental.pallas import tpu as pltpu


def _actor_kernel(x_ref, w1_ref, b1_ref, w2_ref, b2_ref, w3_ref, b3_ref, o_ref):
    """One batch tile, feature-major: x (TILE_B, S) -> o (A, TILE_B) lane-dense."""
    # Only small transpose in the kernel: (TILE_B, S) -> (S, TILE_B), S=32.
    xT = x_ref[...].T

    # Layer 1: (H, S) @ (S, TILE_B) -> f32 accumulate on the MXU; bias + ReLU in f32
    # (safe on v5e's VPU, which has no bf16 elementwise).
    h = jnp.dot(w1_ref[...], xT, preferred_element_type=jnp.float32)
    h = jnp.maximum(h + b1_ref[...], 0.0)

    # Layer 2: cast h to the weight dtype exactly once (no-op for f32 params; single
    # bf16 cast for bf16 params so the MXU sees native bf16 x bf16 operands).
    h = jnp.dot(w2_ref[...], h.astype(w2_ref.dtype),
                preferred_element_type=jnp.float32)
    h = jnp.maximum(h + b2_ref[...], 0.0)

    # Output layer: (A, H) @ (H, TILE_B) -> (A, TILE_B); store is lane-dense on batch.
    o = jnp.dot(w3_ref[...], h.astype(w3_ref.dtype),
                preferred_element_type=jnp.float32)
    o_ref[...] = (o + b3_ref[...]).astype(o_ref.dtype)


@functools.partial(jax.jit,
                   static_argnames=("tile_b", "vmem_limit_bytes", "batch_major_output"))
def continuous_actor_forward(state, params, *, tile_b=2048,
                             vmem_limit_bytes=32 * 1024 * 1024,
                             batch_major_output=True):
    """state: (B, state_dim).  params (PyTorch (out, in) weight layout):
         w1t (H, S), b1 (H, 1), w2t (H, H), b2 (H, 1), w3 (A, H), b3 (A, 1).
    Returns (B, A) f32 if batch_major_output else the kernel-native (A, B) f32."""
    w1t, b1 = params["w1t"], params["b1"]
    w2t, b2 = params["w2t"], params["b2"]
    w3, b3 = params["w3"], params["b3"]

    B, S = state.shape
    H = w1t.shape[0]
    A = w3.shape[0]

    # --- Batch-tile selection ------------------------------------------------------
    # Batch is the lane dim of the output block, so tile_b must be a multiple of 128
    # unless it covers the whole batch (full-dim blocks are always legal).
    tile_b = max(128, (int(tile_b) // 128) * 128)
    # Keep >=2 grid steps when B allows it so ("parallel",) can shard tiles across
    # v7x's two TensorCores (no effect on single-TC v5e/v6e).
    half_b = (B // 256) * 128  # largest 128-multiple <= B/2
    if half_b >= 128:
        tile_b = min(tile_b, half_b)
    if B <= tile_b:
        tile_b = B  # single full-batch tile
    grid = (pl.cdiv(B, tile_b),)
    # NOTE: when B % tile_b != 0 the last state tile reads past the end of `state`;
    # those rows are garbage but their results are masked on writeback, so this is
    # correct by design — do not "fix" it with an in-kernel bounds check.

    const = lambda i: (0, 0)  # weights/biases: fetched once, VMEM-resident across steps
    in_specs = [
        pl.BlockSpec((tile_b, S), lambda i: (i, 0)),  # streamed state tile (dbl-buffered)
        pl.BlockSpec((H, S), const),
        pl.BlockSpec((H, 1), const),
        pl.BlockSpec((H, H), const),
        pl.BlockSpec((H, 1), const),
        pl.BlockSpec((A, H), const),
        pl.BlockSpec((A, 1), const),
    ]
    out_specs = pl.BlockSpec((A, tile_b), lambda i: (0, i))  # lane-dense on batch

    flops = 2 * B * (S * H + H * H + H * A)
    bytes_accessed = (
        B * S * state.dtype.itemsize
        + B * A * 4
        + sum(int(p.size) * p.dtype.itemsize for p in (w1t, b1, w2t, b2, w3, b3))
    )

    out_t = pl.pallas_call(
        _actor_kernel,
        out_shape=jax.ShapeDtypeStruct((A, B), jnp.float32),
        grid=grid,
        in_specs=in_specs,
        out_specs=out_specs,
        compiler_params=pltpu.CompilerParams(
            dimension_semantics=("parallel",),
            vmem_limit_bytes=vmem_limit_bytes,
        ),
        cost_estimate=pl.CostEstimate(
            flops=flops, transcendentals=0, bytes_accessed=bytes_accessed),
    )(state, w1t, b1, w2t, b2, w3, b3)

    if batch_major_output:
        # PyTorch-shaped (B, A) result.  For large B this is an extra B*A*4-byte HBM
        # round trip; pass batch_major_output=False to consume (A, B) directly.
        return out_t.T
    return out_t


def init_params(key, state_dim, action_dim, hidden_units=256, dtype=jnp.float32):
    """PyTorch nn.Linear default init (uniform(-1/sqrt(fan_in), 1/sqrt(fan_in))).
    Weights kept in PyTorch's native (out, in) layout; biases as (out, 1) columns."""
    def linear_init(k, fan_in, fan_out):
        kw, kb = jax.random.split(k)
        bound = 1.0 / jnp.sqrt(jnp.float32(fan_in))
        w = jax.random.uniform(kw, (fan_out, fan_in), jnp.float32, -bound, bound)
        b = jax.random.uniform(kb, (fan_out, 1), jnp.float32, -bound, bound)
        return w.astype(dtype), b.astype(dtype)

    k1, k2, k3 = jax.random.split(key, 3)
    w1t, b1 = linear_init(k1, state_dim, hidden_units)
    w2t, b2 = linear_init(k2, hidden_units, hidden_units)
    w3, b3 = linear_init(k3, hidden_units, action_dim)
    return {"w1t": w1t, "b1": b1, "w2t": w2t, "b2": b2, "w3": w3, "b3": b3}


def _reference(state, params):
    """Plain-JAX reference (same math as the PyTorch module), mirroring the kernel's
    dtype handling: activations cast to the weight dtype before each matmul, f32 acc."""
    hp = jax.lax.Precision.HIGHEST

    def lin(x, w, b):
        y = jnp.dot(x.astype(w.dtype), w.T, precision=hp,
                    preferred_element_type=jnp.float32)
        return y + b.reshape(1, -1).astype(jnp.float32)

    h = jnp.maximum(lin(state, params["w1t"], params["b1"]), 0.0)
    h = jnp.maximum(lin(h, params["w2t"], params["b2"]), 0.0)
    return lin(h, params["w3"], params["b3"])


if __name__ == "__main__":
    key = jax.random.PRNGKey(0)
    k_param, k_state = jax.random.split(key)

    # Small shapes consistent with the module (hidden_units=256 is the nn.Module default).
    batch, state_dim, action_dim, hidden_units = 8, 32, 8, 256

    # --- f32 path: matches the PyTorch module exactly. ---
    params = init_params(k_param, state_dim, action_dim, hidden_units, dtype=jnp.float32)
    state = jax.random.normal(k_state, (batch, state_dim), jnp.float32)

    out = jax.block_until_ready(continuous_actor_forward(state, params))
    assert out.shape == (batch, action_dim)
    ref = _reference(state, params)
    err = float(jnp.max(jnp.abs(out - ref)))
    assert jnp.allclose(out, ref, atol=1e-3, rtol=1e-3), err

    # --- bf16 streaming path (perf config): bf16 state + params, f32 MXU accumulation. ---
    params_bf16 = jax.tree_util.tree_map(lambda p: p.astype(jnp.bfloat16), params)
    state_bf16 = state.astype(jnp.bfloat16)
    out_bf16 = jax.block_until_ready(
        continuous_actor_forward(state_bf16, params_bf16, batch_major_output=False))
    assert out_bf16.shape == (action_dim, batch)
    ref_bf16 = _reference(state_bf16, params_bf16)
    err_bf16 = float(jnp.max(jnp.abs(out_bf16.T - ref_bf16)))
    assert jnp.allclose(out_bf16.T, ref_bf16, atol=1e-2, rtol=1e-2), err_bf16

    print("KERNEL_OK")
</pallas_src>

<mosaic_0001>
module attributes {stable_mosaic.version = 11 : i64} {
  func.func @_actor_kernel(%arg0: i32, %arg1: memref<8x32xf32, #tpu.memory_space<vmem>>, %arg2: memref<256x32xf32, #tpu.memory_space<vmem>>, %arg3: memref<256x1xf32, #tpu.memory_space<vmem>>, %arg4: memref<256x256xf32, #tpu.memory_space<vmem>>, %arg5: memref<256x1xf32, #tpu.memory_space<vmem>>, %arg6: memref<8x256xf32, #tpu.memory_space<vmem>>, %arg7: memref<8x1xf32, #tpu.memory_space<vmem>>, %arg8: memref<8x8xf32, #tpu.memory_space<vmem>>) attributes {dimension_semantics = [#tpu.dimension_semantics<parallel>], iteration_bounds = array<i64: 1>, scalar_prefetch = 0 : i64, scratch_operands = 0 : i64, tpu.core_type = #tpu.core_type<tc>, window_params = [{transform_indices = @transform_0, window_bounds = array<i64: 8, 32>}, {pipeline_mode = #tpu.pipeline_mode<synchronous>, transform_indices = @transform_1, window_bounds = array<i64: 256, 32>}, {pipeline_mode = #tpu.pipeline_mode<synchronous>, transform_indices = @transform_2, window_bounds = array<i64: 256, 1>}, {pipeline_mode = #tpu.pipeline_mode<synchronous>, transform_indices = @transform_3, window_bounds = array<i64: 256, 256>}, {pipeline_mode = #tpu.pipeline_mode<synchronous>, transform_indices = @transform_4, window_bounds = array<i64: 256, 1>}, {pipeline_mode = #tpu.pipeline_mode<synchronous>, transform_indices = @transform_5, window_bounds = array<i64: 8, 256>}, {pipeline_mode = #tpu.pipeline_mode<synchronous>, transform_indices = @transform_6, window_bounds = array<i64: 8, 1>}, {transform_indices = @transform_7, window_bounds = array<i64: 8, 8>}]} {
    %c0 = arith.constant 0 : index
    %c0_0 = arith.constant 0 : index
    %0 = vector.load %arg1[%c0, %c0_0] : memref<8x32xf32, #tpu.memory_space<vmem>>, vector<8x32xf32>
    %1 = tpu.transpose %0, [1, 0] : vector<8x32xf32> -> vector<32x8xf32>
    %c0_1 = arith.constant 0 : index
    %c0_2 = arith.constant 0 : index
    %2 = vector.load %arg2[%c0_1, %c0_2] : memref<256x32xf32, #tpu.memory_space<vmem>>, vector<256x32xf32>
    %cst = arith.constant dense<0.000000e+00> : vector<256x8xf32>
    %3 = tpu.matmul %2, %1, %cst {dimension_numbers = #tpu.dot_dimension_numbers<[1], [0], [0], [1], [0, 0, 1, 1], [], []>} : vector<256x32xf32>, vector<32x8xf32>, vector<256x8xf32> -> vector<256x8xf32>
    %c0_3 = arith.constant 0 : index
    %c0_4 = arith.constant 0 : index
    %4 = vector.load %arg3[%c0_3, %c0_4] : memref<256x1xf32, #tpu.memory_space<vmem>>, vector<256x1xf32>
    %5 = vector.broadcast %4 : vector<256x1xf32> to vector<256x8xf32>
    %6 = arith.addf %3, %5 : vector<256x8xf32>
    %cst_5 = arith.constant 0.000000e+00 : f32
    %7 = vector.broadcast %cst_5 : f32 to vector<256x8xf32>
    %8 = arith.maximumf %6, %7 : vector<256x8xf32>
    %c0_6 = arith.constant 0 : index
    %c0_7 = arith.constant 0 : index
    %9 = vector.load %arg4[%c0_6, %c0_7] : memref<256x256xf32, #tpu.memory_space<vmem>>, vector<256x256xf32>
    %cst_8 = arith.constant dense<0.000000e+00> : vector<256x8xf32>
    %10 = tpu.matmul %9, %8, %cst_8 {dimension_numbers = #tpu.dot_dimension_numbers<[1], [0], [0], [1], [0, 0, 1, 1], [], []>} : vector<256x256xf32>, vector<256x8xf32>, vector<256x8xf32> -> vector<256x8xf32>
    %c0_9 = arith.constant 0 : index
    %c0_10 = arith.constant 0 : index
    %11 = vector.load %arg5[%c0_9, %c0_10] : memref<256x1xf32, #tpu.memory_space<vmem>>, vector<256x1xf32>
    %12 = vector.broadcast %11 : vector<256x1xf32> to vector<256x8xf32>
    %13 = arith.addf %10, %12 : vector<256x8xf32>
    %cst_11 = arith.constant 0.000000e+00 : f32
    %14 = vector.broadcast %cst_11 : f32 to vector<256x8xf32>
    %15 = arith.maximumf %13, %14 : vector<256x8xf32>
    %c0_12 = arith.constant 0 : index
    %c0_13 = arith.constant 0 : index
    %16 = vector.load %arg6[%c0_12, %c0_13] : memref<8x256xf32, #tpu.memory_space<vmem>>, vector<8x256xf32>
    %cst_14 = arith.constant dense<0.000000e+00> : vector<8x8xf32>
    %17 = tpu.matmul %16, %15, %cst_14 {dimension_numbers = #tpu.dot_dimension_numbers<[1], [0], [0], [1], [0, 0, 1, 1], [], []>} : vector<8x256xf32>, vector<256x8xf32>, vector<8x8xf32> -> vector<8x8xf32>
    %c0_15 = arith.constant 0 : index
    %c0_16 = arith.constant 0 : index
    %18 = vector.load %arg7[%c0_15, %c0_16] : memref<8x1xf32, #tpu.memory_space<vmem>>, vector<8x1xf32>
    %19 = vector.broadcast %18 : vector<8x1xf32> to vector<8x8xf32>
    %20 = arith.addf %17, %19 : vector<8x8xf32>
    %c0_17 = arith.constant 0 : index
    %c0_18 = arith.constant 0 : index
    %21 = vector.load %arg8[%c0_17, %c0_18] : memref<8x8xf32, #tpu.memory_space<vmem>>, vector<8x8xf32>
    tpu.vector_store %arg8[%c0_17, %c0_18], %20 {strides = array<i32>} : memref<8x8xf32, #tpu.memory_space<vmem>>, vector<8x8xf32>,
    return
  }
  func.func @transform_0(%arg0: i32) -> (i32, i32) {
    %c0_i32 = arith.constant 0 : i32
    %c0_i32_0 = arith.constant 0 : i32
    return %arg0, %c0_i32 : i32, i32
  }
  func.func @transform_1(%arg0: i32) -> (i32, i32) {
    %c0_i32 = arith.constant 0 : i32
    %c0_i32_0 = arith.constant 0 : i32
    %c0_i32_1 = arith.constant 0 : i32
    return %c0_i32, %c0_i32_0 : i32, i32
  }
  func.func @transform_2(%arg0: i32) -> (i32, i32) {
    %c0_i32 = arith.constant 0 : i32
    %c0_i32_0 = arith.constant 0 : i32
    %c0_i32_1 = arith.constant 0 : i32
    return %c0_i32, %c0_i32_0 : i32, i32
  }
  func.func @transform_3(%arg0: i32) -> (i32, i32) {
    %c0_i32 = arith.constant 0 : i32
    %c0_i32_0 = arith.constant 0 : i32
    %c0_i32_1 = arith.constant 0 : i32
    return %c0_i32, %c0_i32_0 : i32, i32
  }
  func.func @transform_4(%arg0: i32) -> (i32, i32) {
    %c0_i32 = arith.constant 0 : i32
    %c0_i32_0 = arith.constant 0 : i32
    %c0_i32_1 = arith.constant 0 : i32
    return %c0_i32, %c0_i32_0 : i32, i32
  }
  func.func @transform_5(%arg0: i32) -> (i32, i32) {
    %c0_i32 = arith.constant 0 : i32
    %c0_i32_0 = arith.constant 0 : i32
    %c0_i32_1 = arith.constant 0 : i32
    return %c0_i32, %c0_i32_0 : i32, i32
  }
  func.func @transform_6(%arg0: i32) -> (i32, i32) {
    %c0_i32 = arith.constant 0 : i32
    %c0_i32_0 = arith.constant 0 : i32
    %c0_i32_1 = arith.constant 0 : i32
    return %c0_i32, %c0_i32_0 : i32, i32
  }
  func.func @transform_7(%arg0: i32) -> (i32, i32) {
    %c0_i32 = arith.constant 0 : i32
    %c0_i32_0 = arith.constant 0 : i32
    return %c0_i32, %arg0 : i32, i32
  }
}

</mosaic_0001>

<bundles_post_ra>
// kernel: continuous_actor_forward.1
= control target key start
LH: loop header
LB: loop body
LE: loop exit
PB: predicated region body
PF: predicated region fallthrough
CT: control target
= control target key end

     0   :  { %vm251_vm0 = vcmask 261120   ;;  %v1472_v0 = vmov 0   ;;  %vm1199_vm1 = vcmask 64512   ;;  %s2123_s2 = inlined_call_operand.vmem [shape: f32[256,1], index: 2, kind: input, shape index: {}]   ;;  %s2124_s0 = inlined_call_operand.vmem [shape: f32[8,32], index: 0, kind: input, shape index: {}]   ;;  %s2125_s1 = inlined_call_operand.vmem [shape: f32[256,32], index: 1, kind: input, shape index: {}]   ;;  %s2126_s4 = inlined_call_operand.vmem [shape: f32[256,1], index: 4, kind: input, shape index: {}]   ;;  %s2127_s6 = inlined_call_operand.vmem [shape: f32[8,1], index: 6, kind: input, shape index: {}]   ;;  %s2128_s3 = inlined_call_operand.vmem [shape: f32[256,256], index: 3, kind: input, shape index: {}]   ;;  %s2129_s5 = inlined_call_operand.vmem [shape: f32[8,256], index: 5, kind: input, shape index: {}]   ;;  %s2130_s7 = inlined_call_operand.vmem [shape: f32[8,8], index: 7, kind: output, shape index: {}]  }
   0x1   :  { %1471 = vset.pattern.permute.xlu1 %v1472_v0  ;;  %1470 = vset.pattern.permute.xlu0 %v1472_v0  ;;  %v61_v1 = vld [vmem:[%s2123_s2 + $0x10] sm:$0xff]  ;;  %v59_v2 = vld [vmem:[%s2123_s2] sm:$0xff]  ;;  %v62_v5 = vld [vmem:[%s2123_s2 + $0x18] sm:$0xff] }
   0x2   :  { %v26_v3 = vld [vmem:[%s2124_s0] sm:$0xff]  ;;  %103 = vperm.xlu1 %1471, %v61_v1   ;;  %93 = vperm.xlu0 %1470, %v59_v2   ;;  %v60_v6 = vld [vmem:[%s2123_s2 + $0x8] sm:$0xff]  ;;  %v29_v8 = vld [vmem:[%s2125_s1 + $0x10] sm:$0xff] }
   0x3   :  { %v27_v4 = vld [vmem:[%s2125_s1] sm:$0xff]  ;;  %1306 = vmatprep.subr.msk.mxu0 %vm251_vm0, %v26_v3  ;;  %v28_v7 = vld [vmem:[%s2125_s1 + $0x8] sm:$0xff]  ;;  %v30_v11 = vld [vmem:[%s2125_s1 + $0x18] sm:$0xff] }
   0x4   :  { %1308 = vmatprep.mubr.msk.f32.mxu0 %vm251_vm0, %v27_v4  ;;  %1307 = vmatpush3.xpose.msk.msra.mxu0 %vm251_vm0, %v26_v3  ;;  %v64_v9 = vld [vmem:[%s2123_s2 + $0x28] sm:$0xff]  ;;  %v63_v10 = vld [vmem:[%s2123_s2 + $0x20] sm:$0xff]  ;;  %v66_v13 = vld [vmem:[%s2123_s2 + $0x38] sm:$0xff] }
   0x5   :  { %v31_v12 = vld [vmem:[%s2125_s1 + $0x20] sm:$0xff]  ;;  %v65_v14 = vld [vmem:[%s2123_s2 + $0x30] sm:$0xff]  ;;  %v32_v15 = vld [vmem:[%s2125_s1 + $0x28] sm:$0xff] }
   0x6   :  { %108 = vperm.xlu1 %1471, %v62_v5   ;;  %98 = vperm.xlu0 %1470, %v60_v6   ;;  %v33_v16 = vld [vmem:[%s2125_s1 + $0x30] sm:$0xff]  ;;  %v68_v17 = vld [vmem:[%s2123_s2 + $0x48] sm:$0xff]  ;;  %v67_v18 = vld [vmem:[%s2123_s2 + $0x40] sm:$0xff] }
   0x7   :  { %1309 = vmatmul.mubr.msk.f32.vlgmr.msra.gmra.mrb[0].mxu0 %vm251_vm0, %v28_v7  ;;  %v34_v19 = vld [vmem:[%s2125_s1 + $0x38] sm:$0xff]  ;;  %v35_v20 = vld [vmem:[%s2125_s1 + $0x40] sm:$0xff]  ;;  %v69_v22 = vld [vmem:[%s2123_s2 + $0x50] sm:$0xff] }
   0x8   :  { %1311 = vmatprep.mubr.msk.f32.mxu0 %vm251_vm0, %v29_v8  ;;  %v70_v21 = vld [vmem:[%s2123_s2 + $0x58] sm:$0xff]  ;;  %v36_v23 = vld [vmem:[%s2125_s1 + $0x48] sm:$0xff]  ;;  %v37_v24 = vld [vmem:[%s2125_s1 + $0x50] sm:$0xff] }
   0x9   :  { %v72_v25 = vld [vmem:[%s2123_s2 + $0x68] sm:$0xff]  ;;  %v71_v26 = vld [vmem:[%s2123_s2 + $0x60] sm:$0xff]  ;;  %v38_v27 = vld [vmem:[%s2125_s1 + $0x58] sm:$0xff] }
   0xa   :  { %118 = vperm.xlu1 %1471, %v64_v9   ;;  %113 = vperm.xlu0 %1470, %v63_v10   ;;  %v39_v28 = vld [vmem:[%s2125_s1 + $0x60] sm:$0xff]  ;;  %v74_v29 = vld [vmem:[%s2123_s2 + $0x78] sm:$0xff]  ;;  %v73_v30 = vld [vmem:[%s2123_s2 + $0x70] sm:$0xff] }
   0xb   :  { %1312 = vmatmul.mubr.msk.f32.gmra.mrb[2].mxu0 %vm251_vm0, %v30_v11  ;;  %v40_v31 = vld [vmem:[%s2125_s1 + $0x68] sm:$0xff]  ;;  %v41_v32 = vld [vmem:[%s2125_s1 + $0x70] sm:$0xff]  ;;  %v75_v34 = vld [vmem:[%s2123_s2 + $0x80] sm:$0xff] }
   0xc   :  { %1314 = vmatprep.mubr.msk.f32.mxu0 %vm251_vm0, %v31_v12  ;;  %v76_v33 = vld [vmem:[%s2123_s2 + $0x88] sm:$0xff]  ;;  %v42_v35 = vld [vmem:[%s2125_s1 + $0x78] sm:$0xff]  ;;  %v43_v36 = vld [vmem:[%s2125_s1 + $0x80] sm:$0xff] }
   0xd   :  { %v78_v37 = vld [vmem:[%s2123_s2 + $0x98] sm:$0xff]  ;;  %v77_v38 = vld [vmem:[%s2123_s2 + $0x90] sm:$0xff]  ;;  %v44_v39 = vld [vmem:[%s2125_s1 + $0x88] sm:$0xff] }
   0xe   :  { %128 = vperm.xlu1 %1471, %v66_v13   ;;  %123 = vperm.xlu0 %1470, %v65_v14   ;;  %v45_v40 = vld [vmem:[%s2125_s1 + $0x90] sm:$0xff]  ;;  %v80_v41 = vld [vmem:[%s2123_s2 + $0xa8] sm:$0xff]  ;;  %v79_v42 = vld [vmem:[%s2123_s2 + $0xa0] sm:$0xff] }
   0xf   :  { %1315 = vmatmul.mubr.msk.f32.gmra.mrb[4].mxu0 %vm251_vm0, %v32_v15  ;;  %v46_v43 = vld [vmem:[%s2125_s1 + $0x98] sm:$0xff]  ;;  %v47_v44 = vld [vmem:[%s2125_s1 + $0xa0] sm:$0xff]  ;;  %v81_v46 = vld [vmem:[%s2123_s2 + $0xb0] sm:$0xff] }
  0x10   :  { %1317 = vmatprep.mubr.msk.f32.mxu0 %vm251_vm0, %v33_v16  ;;  %v82_v45 = vld [vmem:[%s2123_s2 + $0xb8] sm:$0xff]  ;;  %v48_v47 = vld [vmem:[%s2125_s1 + $0xa8] sm:$0xff]  ;;  %v49_v48 = vld [vmem:[%s2125_s1 + $0xb0] sm:$0xff] }
  0x11   :  { %v84_v49 = vld [vmem:[%s2123_s2 + $0xc8] sm:$0xff]  ;;  %v83_v50 = vld [vmem:[%s2123_s2 + $0xc0] sm:$0xff]  ;;  %v50_v51 = vld [vmem:[%s2125_s1 + $0xb8] sm:$0xff] }
  0x12   :  { %138 = vperm.xlu1 %1471, %v68_v17   ;;  %133 = vperm.xlu0 %1470, %v67_v18   ;;  %v51_v52 = vld [vmem:[%s2125_s1 + $0xc0] sm:$0xff]  ;;  %v86_v53 = vld [vmem:[%s2123_s2 + $0xd8] sm:$0xff]  ;;  %v85_v54 = vld [vmem:[%s2123_s2 + $0xd0] sm:$0xff] }
  0x13   :  { %1318 = vmatmul.mubr.msk.f32.gmra.mrb[6].mxu0 %vm251_vm0, %v34_v19  ;;  %v52_v55 = vld [vmem:[%s2125_s1 + $0xc8] sm:$0xff]  ;;  %v53_v56 = vld [vmem:[%s2125_s1 + $0xd0] sm:$0xff]  ;;  %v87_v58 = vld [vmem:[%s2123_s2 + $0xe0] sm:$0xff] }
  0x14   :  { %1320 = vmatprep.mubr.msk.f32.mxu0 %vm251_vm0, %v35_v20  ;;  %v88_v57 = vld [vmem:[%s2123_s2 + $0xe8] sm:$0xff]  ;;  %v54_v59 = vld [vmem:[%s2125_s1 + $0xd8] sm:$0xff]  ;;  %v55_v60 = vld [vmem:[%s2125_s1 + $0xe0] sm:$0xff]  ;;  %v1473_v20 = vmov 0.0|0.0  }
  0x15   :  { %v90_v61 = vld [vmem:[%s2123_s2 + $0xf8] sm:$0xff]  ;;  %v89_v62 = vld [vmem:[%s2123_s2 + $0xf0] sm:$0xff]  ;;  %v56_v63 = vld [vmem:[%s2125_s1 + $0xe8] sm:$0xff]  ;;  %1356 = vmatprep.subr.bf16.mxu0 %v1473_v20  ;;  %1436 = vmatprep.subr.bf16.mxu1 %v1473_v20 }
  0x16   :  { %148 = vperm.xlu1 %1471, %v70_v21   ;;  %143 = vperm.xlu0 %1470, %v69_v22   ;;  %v57_v0 = vld [vmem:[%s2125_s1 + $0xf0] sm:$0xff]  ;;  %v689_v1 = vld [vmem:[%s2126_s4 + $0x88] sm:$0xff]  ;;  %v688_v2 = vld [vmem:[%s2126_s4 + $0x80] sm:$0xff] }
  0x17   :  { %1321 = vmatmul.mubr.msk.f32.gmra.mrb[8].mxu0 %vm251_vm0, %v36_v23  ;;  %v58_v3 = vld [vmem:[%s2125_s1 + $0xf8] sm:$0xff]  ;;  %v673_v4 = vld [vmem:[%s2126_s4 + $0x8] sm:$0xff]  ;;  %v672_v5 = vld [vmem:[%s2126_s4] sm:$0xff] }
  0x18   :  { %1323 = vmatprep.mubr.msk.f32.mxu0 %vm251_vm0, %v37_v24  ;;  %v691_v6 = vld [vmem:[%s2126_s4 + $0x98] sm:$0xff]  ;;  %v690_v7 = vld [vmem:[%s2126_s4 + $0x90] sm:$0xff]  ;;  %v693_v10 = vld [vmem:[%s2126_s4 + $0xa8] sm:$0xff] }
  0x19   :  { %v675_v8 = vld [vmem:[%s2126_s4 + $0x18] sm:$0xff]  ;;  %v674_v9 = vld [vmem:[%s2126_s4 + $0x10] sm:$0xff]  ;;  %v692_v11 = vld [vmem:[%s2126_s4 + $0xa0] sm:$0xff] }
  0x1a   :  { %158 = vperm.xlu1 %1471, %v72_v25   ;;  %153 = vperm.xlu0 %1470, %v71_v26   ;;  %v677_v12 = vld [vmem:[%s2126_s4 + $0x28] sm:$0xff]  ;;  %v676_v13 = vld [vmem:[%s2126_s4 + $0x20] sm:$0xff]  ;;  %v695_v14 = vld [vmem:[%s2126_s4 + $0xb8] sm:$0xff] }
  0x1b   :  { %1324 = vmatmul.mubr.msk.f32.gmra.mrb[10].mxu0 %vm251_vm0, %v38_v27  ;;  %v694_v15 = vld [vmem:[%s2126_s4 + $0xb0] sm:$0xff]  ;;  %v679_v16 = vld [vmem:[%s2126_s4 + $0x38] sm:$0xff]  ;;  %v697_v18 = vld [vmem:[%s2126_s4 + $0xc8] sm:$0xff] }
  0x1c   :  { %1326 = vmatprep.mubr.msk.f32.mxu0 %vm251_vm0, %v39_v28  ;;  %v678_v17 = vld [vmem:[%s2126_s4 + $0x30] sm:$0xff]  ;;  %v696_v19 = vld [vmem:[%s2126_s4 + $0xc0] sm:$0xff]  ;;  %v681_v21 = vld [vmem:[%s2126_s4 + $0x48] sm:$0xff] }
  0x1d   :  { %v680_v22 = vld [vmem:[%s2126_s4 + $0x40] sm:$0xff]  ;;  %v699_v23 = vld [vmem:[%s2126_s4 + $0xd8] sm:$0xff]  ;;  %v698_v24 = vld [vmem:[%s2126_s4 + $0xd0] sm:$0xff] }
  0x1e   :  { %168 = vperm.xlu1 %1471, %v74_v29   ;;  %163 = vperm.xlu0 %1470, %v73_v30   ;;  %v683_v25 = vld [vmem:[%s2126_s4 + $0x58] sm:$0xff]  ;;  %v682_v26 = vld [vmem:[%s2126_s4 + $0x50] sm:$0xff]  ;;  %v701_v27 = vld [vmem:[%s2126_s4 + $0xe8] sm:$0xff] }
  0x1f   :  { %1327 = vmatmul.mubr.msk.f32.gmra.mrb[12].mxu0 %vm251_vm0, %v40_v31  ;;  %v700_v28 = vld [vmem:[%s2126_s4 + $0xe0] sm:$0xff]  ;;  %v685_v29 = vld [vmem:[%s2126_s4 + $0x68] sm:$0xff]  ;;  %v703_v31 = vld [vmem:[%s2126_s4 + $0xf8] sm:$0xff] }
  0x20   :  { %1329 = vmatprep.mubr.msk.f32.mxu0 %vm251_vm0, %v41_v32  ;;  %v684_v30 = vld [vmem:[%s2126_s4 + $0x60] sm:$0xff]  ;;  %v702_v32 = vld [vmem:[%s2126_s4 + $0xf0] sm:$0xff] }
  0x22   :  { %178 = vperm.xlu1 %1471, %v76_v33   ;;  %173 = vperm.xlu0 %1470, %v75_v34   ;;  %v687_v33 = vld [vmem:[%s2126_s4 + $0x78] sm:$0xff]  ;;  %v686_v34 = vld [vmem:[%s2126_s4 + $0x70] sm:$0xff] }
  0x23   :  { %1330 = vmatmul.mubr.msk.f32.gmra.mrb[14].mxu0 %vm251_vm0, %v42_v35  ;;  %v1123_v35 = vld [vmem:[%s2127_s6] sm:$0xff] }
  0x24   :  { %1332 = vmatprep.mubr.msk.f32.mxu0 %vm251_vm0, %v43_v36  ;;  %v609_v36 = vld [vmem:[%s2128_s3 + $0x8] sm:$0xff] }
  0x26   :  { %188 = vperm.xlu1 %1471, %v78_v37   ;;  %183 = vperm.xlu0 %1470, %v77_v38   ;;  %v639_v37 = vld [vmem:[%s2128_s3 + $0xf8] sm:$0xff] }
  0x27   :  { %1333 = vmatmul.mubr.msk.f32.gmra.mrb[16].mxu0 %vm251_vm0, %v44_v39  ;;  %1003 = vmatprep.mubr.f32.mxu1 %v639_v37 }
  0x28   :  { %1335 = vmatprep.mubr.msk.f32.mxu0 %vm251_vm0, %v45_v40 }
  0x2a   :  { %198 = vperm.xlu1 %1471, %v80_v41   ;;  %193 = vperm.xlu0 %1470, %v79_v42  }
  0x2b   :  { %1336 = vmatmul.mubr.msk.f32.gmra.mrb[18].mxu0 %vm251_vm0, %v46_v43 }
  0x2c   :  { %1338 = vmatprep.mubr.msk.f32.mxu0 %vm251_vm0, %v47_v44 }
  0x2e   :  { %208 = vperm.xlu1 %1471, %v82_v45   ;;  %203 = vperm.xlu0 %1470, %v81_v46  }
  0x2f   :  { %1339 = vmatmul.mubr.msk.f32.gmra.mrb[20].mxu0 %vm251_vm0, %v48_v47 }
  0x30   :  { %1341 = vmatprep.mubr.msk.f32.mxu0 %vm251_vm0, %v49_v48 }
  0x32   :  { %218 = vperm.xlu1 %1471, %v84_v49   ;;  %213 = vperm.xlu0 %1470, %v83_v50  }
  0x33   :  { %1342 = vmatmul.mubr.msk.f32.gmra.mrb[22].mxu0 %vm251_vm0, %v50_v51 }
  0x34   :  { %1344 = vmatprep.mubr.msk.f32.mxu0 %vm251_vm0, %v51_v52 }
  0x36   :  { %228 = vperm.xlu1 %1471, %v86_v53   ;;  %223 = vperm.xlu0 %1470, %v85_v54  }
  0x37   :  { %1345 = vmatmul.mubr.msk.f32.gmra.mrb[24].mxu0 %vm251_vm0, %v52_v55 }
  0x38   :  { %1347 = vmatprep.mubr.msk.f32.mxu0 %vm251_vm0, %v53_v56 }
  0x3a   :  { %238 = vperm.xlu1 %1471, %v88_v57   ;;  %233 = vperm.xlu0 %1470, %v87_v58  }
  0x3b   :  { %1348 = vmatmul.mubr.msk.f32.gmra.mrb[26].mxu0 %vm251_vm0, %v54_v59 }
  0x3c   :  { %1350 = vmatprep.mubr.msk.f32.mxu0 %vm251_vm0, %v55_v60 }
  0x3e   :  { %248 = vperm.xlu1 %1471, %v90_v61   ;;  %243 = vperm.xlu0 %1470, %v89_v62  }
  0x3f   :  { %1351 = vmatmul.mubr.msk.f32.gmra.mrb[28].mxu0 %vm251_vm0, %v56_v63 }
  0x40   :  { %1353 = vmatprep.mubr.msk.f32.mxu0 %vm251_vm0, %v57_v0 }
  0x42   :  { %791 = vperm.xlu1 %1471, %v689_v1   ;;  %786 = vperm.xlu0 %1470, %v688_v2  }
  0x43   :  { %1354 = vmatmul.mubr.msk.f32.gmra.mrb[30].mxu0 %vm251_vm0, %v58_v3 }
  0x44   :  { %928 = vmatprep.mubr.f32.mxu0 %v609_v36 }
  0x46   :  { %711 = vperm.xlu1 %1471, %v673_v4   ;;  %706 = vperm.xlu0 %1470, %v672_v5  }
  0x4a   :  { %801 = vperm.xlu1 %1471, %v691_v6   ;;  %796 = vperm.xlu0 %1470, %v690_v7  }
  0x4e   :  { %721 = vperm.xlu1 %1471, %v675_v8   ;;  %716 = vperm.xlu0 %1470, %v674_v9  }
  0x52   :  { %811 = vperm.xlu1 %1471, %v693_v10   ;;  %806 = vperm.xlu0 %1470, %v692_v11  }
  0x56   :  { %731 = vperm.xlu1 %1471, %v677_v12   ;;  %726 = vperm.xlu0 %1470, %v676_v13  }
  0x5a   :  { %821 = vperm.xlu1 %1471, %v695_v14   ;;  %816 = vperm.xlu0 %1470, %v694_v15  }
  0x5e   :  { %741 = vperm.xlu1 %1471, %v679_v16   ;;  %736 = vperm.xlu0 %1470, %v678_v17  }
  0x62   :  { %831 = vperm.xlu1 %1471, %v697_v18   ;;  %826 = vperm.xlu0 %1470, %v696_v19  }
  0x66   :  { %751 = vperm.xlu1 %1471, %v681_v21   ;;  %746 = vperm.xlu0 %1470, %v680_v22  }
  0x6a   :  { %841 = vperm.xlu1 %1471, %v699_v23   ;;  %836 = vperm.xlu0 %1470, %v698_v24  }
  0x6e   :  { %761 = vperm.xlu1 %1471, %v683_v25   ;;  %756 = vperm.xlu0 %1470, %v682_v26  }
  0x72   :  { %851 = vperm.xlu1 %1471, %v701_v27   ;;  %846 = vperm.xlu0 %1470, %v700_v28  }
  0x76   :  { %771 = vperm.xlu1 %1471, %v685_v29   ;;  %766 = vperm.xlu0 %1470, %v684_v30  }
  0x7a   :  { %861 = vperm.xlu1 %1471, %v703_v31   ;;  %856 = vperm.xlu0 %1470, %v702_v32  }
  0x7e   :  { %781 = vperm.xlu1 %1471, %v687_v33   ;;  %776 = vperm.xlu0 %1470, %v686_v34  }
  0x81   :  { %v104_v38 = vpop.permute.xlu1 %103  ;;  %v94_v39 = vpop.permute.xlu0 %93 }
  0x82   :  { %1126 = vperm.xlu0 %1470, %v1123_v35  }
  0x85   :  { %v109_v40 = vpop.permute.xlu1 %108  ;;  %v99_v41 = vpop.permute.xlu0 %98 }
  0x89   :  { %v119_v42 = vpop.permute.xlu1 %118  ;;  %v114_v43 = vpop.permute.xlu0 %113 }
  0x8d   :  { %v129_v44 = vpop.permute.xlu1 %128  ;;  %v124_v45 = vpop.permute.xlu0 %123 }
  0x91   :  { %v139_v46 = vpop.permute.xlu1 %138  ;;  %v134_v47 = vpop.permute.xlu0 %133 }
  0x95   :  { %v149_v48 = vpop.permute.xlu1 %148  ;;  %v144_v50 = vpop.permute.xlu0 %143 }
  0x99   :  { %v159_v59 = vpop.permute.xlu1 %158  ;;  %v154_v62 = vpop.permute.xlu0 %153 }
  0x9d   :  { %v169_v7 = vpop.permute.xlu1 %168  ;;  %v164_v10 = vpop.permute.xlu0 %163 }
  0xa1   :  { %v179_v21 = vpop.permute.xlu1 %178  ;;  %v174_v24 = vpop.permute.xlu0 %173 }
  0xa5   :  { %v189_v33 = vpop.permute.xlu1 %188  ;;  %v184_v36 = vpop.permute.xlu0 %183 }
  0xda   :  { %v1310_v49 = vpop.f32.mrb[0].mxu0 }
  0xdb   :  { %v423_v51 = vadd.f32 %v1310_v49, %v99_v41  ;;  %v417_v52 = vpop.f32.mrb[1].mxu0  ;;  %v194_v49 = vpop.permute.xlu0 %193 }
  0xdc   :  { %v418_v53 = vadd.f32 %v417_v52, %v94_v39 }
  0xdd   :  { %v577_v54 = vmax.f32 %v423_v51, 0.0 }
  0xde   :  { %v576_v55 = vmax.f32 %v418_v53, 0.0  ;;  %v1313_v56 = vpop.f32.mrb[2].mxu0 }
  0xdf   :  { %v433_v57 = vadd.f32 %v1313_v56, %v109_v40  ;;  %v427_v58 = vpop.f32.mrb[3].mxu0 }
  0xe0   :  { %v1357_v60 = vpack.c.bf16 %v577_v54, %v576_v55  ;;  %v428_v61 = vadd.f32 %v427_v58, %v104_v38 }
  0xe1   :  { %v579_v63 = vmax.f32 %v433_v57, 0.0 }
  0xe2   :  { %v578_v0 = vmax.f32 %v428_v61, 0.0  ;;  %v1316_v1 = vpop.f32.mrb[4].mxu0  ;;  %1358 = vmatpush1.bf16.msra.mxu0 %v1357_v60  ;;  %1452 = vmatpush1.bf16.msra.mxu1 %v1357_v60  ;;  %v204_v61 = vpop.permute.xlu0 %203 }
  0xe3   :  { %v443_v2 = vadd.f32 %v1316_v1, %v119_v42  ;;  %v437_v3 = vpop.f32.mrb[5].mxu0  ;;  %1359 = vmatprep.subr.bf16.mxu0 %v1473_v20  ;;  %1437 = vmatprep.subr.bf16.mxu1 %v1473_v20 }
  0xe4   :  { %v1360_v4 = vpack.c.bf16 %v579_v63, %v578_v0  ;;  %v438_v5 = vadd.f32 %v437_v3, %v114_v43 }
  0xe5   :  { %v581_v6 = vmax.f32 %v443_v2, 0.0 }
  0xe6   :  { %v580_v8 = vmax.f32 %v438_v5, 0.0  ;;  %v1319_v9 = vpop.f32.mrb[6].mxu0  ;;  %1361 = vmatpush1.bf16.msra.mxu0 %v1360_v4  ;;  %1453 = vmatpush1.bf16.msra.mxu1 %v1360_v4 }
  0xe7   :  { %v453_v11 = vadd.f32 %v1319_v9, %v129_v44  ;;  %v447_v12 = vpop.f32.mrb[7].mxu0  ;;  %1362 = vmatprep.subr.bf16.mxu0 %v1473_v20  ;;  %1438 = vmatprep.subr.bf16.mxu1 %v1473_v20 }
  0xe8   :  { %v1363_v13 = vpack.c.bf16 %v581_v6, %v580_v8  ;;  %v448_v14 = vadd.f32 %v447_v12, %v124_v45 }
  0xe9   :  { %v583_v15 = vmax.f32 %v453_v11, 0.0 }
  0xea   :  { %v582_v16 = vmax.f32 %v448_v14, 0.0  ;;  %v1322_v17 = vpop.f32.mrb[8].mxu0  ;;  %1364 = vmatpush1.bf16.msra.mxu0 %v1363_v13  ;;  %1454 = vmatpush1.bf16.msra.mxu1 %v1363_v13 }
  0xeb   :  { %v463_v18 = vadd.f32 %v1322_v17, %v139_v46  ;;  %v457_v19 = vpop.f32.mrb[9].mxu0  ;;  %1365 = vmatprep.subr.bf16.mxu0 %v1473_v20  ;;  %1439 = vmatprep.subr.bf16.mxu1 %v1473_v20  ;;  %v199_v46 = vpop.permute.xlu1 %198 }
  0xec   :  { %v1366_v22 = vpack.c.bf16 %v583_v15, %v582_v16  ;;  %v458_v23 = vadd.f32 %v457_v19, %v134_v47 }
  0xed   :  { %v585_v25 = vmax.f32 %v463_v18, 0.0 }
  0xee   :  { %v584_v26 = vmax.f32 %v458_v23, 0.0  ;;  %v1325_v27 = vpop.f32.mrb[10].mxu0  ;;  %1367 = vmatpush1.bf16.msra.mxu0 %v1366_v22  ;;  %1455 = vmatpush1.bf16.msra.mxu1 %v1366_v22 }
  0xef   :  { %v473_v28 = vadd.f32 %v1325_v27, %v149_v48  ;;  %v467_v29 = vpop.f32.mrb[11].mxu0  ;;  %1368 = vmatprep.subr.bf16.mxu0 %v1473_v20  ;;  %1440 = vmatprep.subr.bf16.mxu1 %v1473_v20  ;;  %v209_v58 = vpop.permute.xlu1 %208 }
  0xf0   :  { %v1369_v30 = vpack.c.bf16 %v585_v25, %v584_v26  ;;  %v468_v31 = vadd.f32 %v467_v29, %v144_v50 }
  0xf1   :  { %v587_v32 = vmax.f32 %v473_v28, 0.0 }
  0xf2   :  { %v586_v34 = vmax.f32 %v468_v31, 0.0  ;;  %v1328_v35 = vpop.f32.mrb[12].mxu0  ;;  %1370 = vmatpush1.bf16.msra.mxu0 %v1369_v30  ;;  %1456 = vmatpush1.bf16.msra.mxu1 %v1369_v30 }
  0xf3   :  { %v483_v37 = vadd.f32 %v1328_v35, %v159_v59  ;;  %v477_v38 = vpop.f32.mrb[13].mxu0  ;;  %1371 = vmatprep.subr.bf16.mxu0 %v1473_v20  ;;  %1441 = vmatprep.subr.bf16.mxu1 %v1473_v20 }
  0xf4   :  { %v1372_v39 = vpack.c.bf16 %v587_v32, %v586_v34  ;;  %v478_v40 = vadd.f32 %v477_v38, %v154_v62 }
  0xf5   :  { %v589_v41 = vmax.f32 %v483_v37, 0.0 }
  0xf6   :  { %v588_v42 = vmax.f32 %v478_v40, 0.0  ;;  %v1331_v43 = vpop.f32.mrb[14].mxu0  ;;  %1373 = vmatpush1.bf16.msra.mxu0 %v1372_v39  ;;  %1457 = vmatpush1.bf16.msra.mxu1 %v1372_v39 }
  0xf7   :  { %v493_v44 = vadd.f32 %v1331_v43, %v169_v7  ;;  %v487_v45 = vpop.f32.mrb[15].mxu0  ;;  %1374 = vmatprep.subr.bf16.mxu0 %v1473_v20  ;;  %1442 = vmatprep.subr.bf16.mxu1 %v1473_v20  ;;  %v219_v7 = vpop.permute.xlu1 %218 }
  0xf8   :  { %v1375_v47 = vpack.c.bf16 %v589_v41, %v588_v42  ;;  %v488_v48 = vadd.f32 %v487_v45, %v164_v10  ;;  %v214_v10 = vpop.permute.xlu0 %213 }
  0xf9   :  { %v591_v50 = vmax.f32 %v493_v44, 0.0 }
  0xfa   :  { %v590_v51 = vmax.f32 %v488_v48, 0.0  ;;  %v1334_v52 = vpop.f32.mrb[16].mxu0  ;;  %1376 = vmatpush1.bf16.msra.mxu0 %v1375_v47  ;;  %1458 = vmatpush1.bf16.msra.mxu1 %v1375_v47 }
  0xfb   :  { %v503_v53 = vadd.f32 %v1334_v52, %v179_v21  ;;  %v497_v54 = vpop.f32.mrb[17].mxu0  ;;  %1377 = vmatprep.subr.bf16.mxu0 %v1473_v20  ;;  %1443 = vmatprep.subr.bf16.mxu1 %v1473_v20  ;;  %v229_v19 = vpop.permute.xlu1 %228 }
  0xfc   :  { %v1378_v55 = vpack.c.bf16 %v591_v50, %v590_v51  ;;  %v498_v56 = vadd.f32 %v497_v54, %v174_v24  ;;  %v224_v23 = vpop.permute.xlu0 %223 }
  0xfd   :  { %v593_v57 = vmax.f32 %v503_v53, 0.0 }
  0xfe   :  { %v592_v59 = vmax.f32 %v498_v56, 0.0  ;;  %v1337_v60 = vpop.f32.mrb[18].mxu0  ;;  %1379 = vmatpush1.bf16.msra.mxu0 %v1378_v55  ;;  %1459 = vmatpush1.bf16.msra.mxu1 %v1378_v55  ;;  %v608_v56 = vld [vmem:[%s2128_s3] sm:$0xff] }
  0xff   :  { %v513_v62 = vadd.f32 %v1337_v60, %v189_v33  ;;  %v507_v63 = vpop.f32.mrb[19].mxu0  ;;  %1380 = vmatprep.subr.bf16.mxu0 %v1473_v20  ;;  %1444 = vmatprep.subr.bf16.mxu1 %v1473_v20  ;;  %v239_v33 = vpop.permute.xlu1 %238  ;;  %v640_v60 = vld [vmem:[%s2128_s3 + $0x100] sm:$0xff] }
 0x100   :  { %v1381_v0 = vpack.c.bf16 %v593_v57, %v592_v59  ;;  %v508_v1 = vadd.f32 %v507_v63, %v184_v36  ;;  %v234_v36 = vpop.permute.xlu0 %233  ;;  %v638_v57 = vld [vmem:[%s2128_s3 + $0xf0] sm:$0xff]  ;;  %v641_v59 = vld [vmem:[%s2128_s3 + $0x108] sm:$0xff]  ;;  %v612_v63 = vld [vmem:[%s2128_s3 + $0x20] sm:$0xff] }
 0x101   :  { %v595_v2 = vmax.f32 %v513_v62, 0.0  ;;  %v643_v62 = vld [vmem:[%s2128_s3 + $0x118] sm:$0xff] }
 0x102   :  { %v594_v3 = vmax.f32 %v508_v1, 0.0  ;;  %v1340_v4 = vpop.f32.mrb[20].mxu0  ;;  %1382 = vmatpush1.bf16.msra.mxu0 %v1381_v0  ;;  %1460 = vmatpush1.bf16.msra.mxu1 %v1381_v0  ;;  %v642_v0 = vld [vmem:[%s2128_s3 + $0x110] sm:$0xff]  ;;  %v615_v1 = vld [vmem:[%s2128_s3 + $0x38] sm:$0xff] }
 0x103   :  { %v523_v5 = vadd.f32 %v1340_v4, %v199_v46  ;;  %v517_v6 = vpop.f32.mrb[21].mxu0  ;;  %1383 = vmatprep.subr.bf16.mxu0 %v1473_v20  ;;  %1445 = vmatprep.subr.bf16.mxu1 %v1473_v20  ;;  %v249_v45 = vpop.permute.xlu1 %248  ;;  %v644_v4 = vld [vmem:[%s2128_s3 + $0x120] sm:$0xff] }
 0x104   :  { %v1384_v8 = vpack.c.bf16 %v595_v2, %v594_v3  ;;  %v518_v9 = vadd.f32 %v517_v6, %v194_v49  ;;  %v244_v48 = vpop.permute.xlu0 %243  ;;  %v645_v2 = vld [vmem:[%s2128_s3 + $0x128] sm:$0xff]  ;;  %v614_v3 = vld [vmem:[%s2128_s3 + $0x30] sm:$0xff]  ;;  %v647_v6 = vld [vmem:[%s2128_s3 + $0x138] sm:$0xff] }
 0x105   :  { %v597_v11 = vmax.f32 %v523_v5, 0.0  ;;  %v617_v5 = vld [vmem:[%s2128_s3 + $0x48] sm:$0xff] }
 0x106   :  { %v596_v12 = vmax.f32 %v518_v9, 0.0  ;;  %v1343_v13 = vpop.f32.mrb[22].mxu0  ;;  %1385 = vmatpush1.bf16.msra.mxu0 %v1384_v8  ;;  %1461 = vmatpush1.bf16.msra.mxu1 %v1384_v8  ;;  %v646_v8 = vld [vmem:[%s2128_s3 + $0x130] sm:$0xff]  ;;  %v619_v9 = vld [vmem:[%s2128_s3 + $0x58] sm:$0xff] }
 0x107   :  { %v533_v14 = vadd.f32 %v1343_v13, %v209_v58  ;;  %v527_v15 = vpop.f32.mrb[23].mxu0  ;;  %1386 = vmatprep.subr.bf16.mxu0 %v1473_v20  ;;  %1446 = vmatprep.subr.bf16.mxu1 %v1473_v20  ;;  %v611_v58 = vld [vmem:[%s2128_s3 + $0x18] sm:$0xff]  ;;  %v621_v13 = vld [vmem:[%s2128_s3 + $0x68] sm:$0xff] }
 0x108   :  { %v1387_v16 = vpack.c.bf16 %v597_v11, %v596_v12  ;;  %v528_v17 = vadd.f32 %v527_v15, %v204_v61  ;;  %v613_v61 = vld [vmem:[%s2128_s3 + $0x28] sm:$0xff]  ;;  %v618_v11 = vld [vmem:[%s2128_s3 + $0x50] sm:$0xff]  ;;  %v648_v12 = vld [vmem:[%s2128_s3 + $0x140] sm:$0xff] }
 0x109   :  { %v599_v18 = vmax.f32 %v533_v14, 0.0  ;;  %v651_v14 = vld [vmem:[%s2128_s3 + $0x158] sm:$0xff]  ;;  %v620_v15 = vld [vmem:[%s2128_s3 + $0x60] sm:$0xff] }
 0x10a   :  { %v598_v21 = vmax.f32 %v528_v17, 0.0  ;;  %v1346_v22 = vpop.f32.mrb[24].mxu0  ;;  %1388 = vmatpush1.bf16.msra.mxu0 %v1387_v16  ;;  %1462 = vmatpush1.bf16.msra.mxu1 %v1387_v16  ;;  %v650_v16 = vld [vmem:[%s2128_s3 + $0x150] sm:$0xff]  ;;  %v623_v17 = vld [vmem:[%s2128_s3 + $0x78] sm:$0xff] }
 0x10b   :  { %v543_v24 = vadd.f32 %v1346_v22, %v219_v7  ;;  %v537_v25 = vpop.f32.mrb[25].mxu0  ;;  %1389 = vmatprep.subr.bf16.mxu0 %v1473_v20  ;;  %1447 = vmatprep.subr.bf16.mxu1 %v1473_v20  ;;  %v616_v7 = vld [vmem:[%s2128_s3 + $0x40] sm:$0xff]  ;;  %v625_v22 = vld [vmem:[%s2128_s3 + $0x88] sm:$0xff] }
 0x10c   :  { %v1390_v26 = vpack.c.bf16 %v599_v18, %v598_v21  ;;  %v538_v27 = vadd.f32 %v537_v25, %v214_v10  ;;  %v649_v10 = vld [vmem:[%s2128_s3 + $0x148] sm:$0xff]  ;;  %v652_v21 = vld [vmem:[%s2128_s3 + $0x160] sm:$0xff]  ;;  %v654_v25 = vld [vmem:[%s2128_s3 + $0x170] sm:$0xff] }
 0x10d   :  { %v601_v28 = vmax.f32 %v543_v24, 0.0  ;;  %v653_v18 = vld [vmem:[%s2128_s3 + $0x168] sm:$0xff]  ;;  %v624_v24 = vld [vmem:[%s2128_s3 + $0x80] sm:$0xff] }
 0x10e   :  { %v600_v29 = vmax.f32 %v538_v27, 0.0  ;;  %v1349_v30 = vpop.f32.mrb[26].mxu0  ;;  %1391 = vmatpush1.bf16.msra.mxu0 %v1390_v26  ;;  %1463 = vmatpush1.bf16.msra.mxu1 %v1390_v26  ;;  %v627_v26 = vld [vmem:[%s2128_s3 + $0x98] sm:$0xff]  ;;  %v657_v27 = vld [vmem:[%s2128_s3 + $0x188] sm:$0xff] }
 0x10f   :  { %v553_v31 = vadd.f32 %v1349_v30, %v229_v19  ;;  %v547_v32 = vpop.f32.mrb[27].mxu0  ;;  %1392 = vmatprep.subr.bf16.mxu0 %v1473_v20  ;;  %1448 = vmatprep.subr.bf16.mxu1 %v1473_v20  ;;  %v622_v19 = vld [vmem:[%s2128_s3 + $0x70] sm:$0xff]  ;;  %v629_v30 = vld [vmem:[%s2128_s3 + $0xa8] sm:$0xff] }
 0x110   :  { %v1393_v34 = vpack.c.bf16 %v601_v28, %v600_v29  ;;  %v548_v35 = vadd.f32 %v547_v32, %v224_v23  ;;  %v655_v23 = vld [vmem:[%s2128_s3 + $0x178] sm:$0xff]  ;;  %v626_v28 = vld [vmem:[%s2128_s3 + $0x90] sm:$0xff]  ;;  %v656_v29 = vld [vmem:[%s2128_s3 + $0x180] sm:$0xff] }
 0x111   :  { %v603_v37 = vmax.f32 %v553_v31, 0.0  ;;  %v659_v31 = vld [vmem:[%s2128_s3 + $0x198] sm:$0xff]  ;;  %v628_v32 = vld [vmem:[%s2128_s3 + $0xa0] sm:$0xff] }
 0x112   :  { %v602_v38 = vmax.f32 %v548_v35, 0.0  ;;  %v1352_v39 = vpop.f32.mrb[28].mxu0  ;;  %1394 = vmatpush1.bf16.msra.mxu0 %v1393_v34  ;;  %1464 = vmatpush1.bf16.msra.mxu1 %v1393_v34  ;;  %v631_v34 = vld [vmem:[%s2128_s3 + $0xb8] sm:$0xff]  ;;  %v661_v35 = vld [vmem:[%s2128_s3 + $0x1a8] sm:$0xff] }
 0x113   :  { %v563_v40 = vadd.f32 %v1352_v39, %v239_v33  ;;  %v557_v41 = vpop.f32.mrb[29].mxu0  ;;  %1395 = vmatprep.subr.bf16.mxu0 %v1473_v20  ;;  %1449 = vmatprep.subr.bf16.mxu1 %v1473_v20  ;;  %v658_v33 = vld [vmem:[%s2128_s3 + $0x190] sm:$0xff]  ;;  %v663_v39 = vld [vmem:[%s2128_s3 + $0x1b8] sm:$0xff] }
 0x114   :  { %v1396_v42 = vpack.c.bf16 %v603_v37, %v602_v38  ;;  %v558_v43 = vadd.f32 %v557_v41, %v234_v36  ;;  %v630_v36 = vld [vmem:[%s2128_s3 + $0xb0] sm:$0xff]  ;;  %v660_v37 = vld [vmem:[%s2128_s3 + $0x1a0] sm:$0xff]  ;;  %v633_v38 = vld [vmem:[%s2128_s3 + $0xc8] sm:$0xff] }
 0x115   :  { %v605_v44 = vmax.f32 %v563_v40, 0.0  ;;  %v632_v40 = vld [vmem:[%s2128_s3 + $0xc0] sm:$0xff]  ;;  %v662_v41 = vld [vmem:[%s2128_s3 + $0x1b0] sm:$0xff] }
 0x116   :  { %v604_v46 = vmax.f32 %v558_v43, 0.0  ;;  %v1355_v47 = vpop.f32.mrb[30].mxu0  ;;  %1397 = vmatpush1.bf16.msra.mxu0 %v1396_v42  ;;  %1465 = vmatpush1.bf16.msra.mxu1 %v1396_v42  ;;  %v635_v42 = vld [vmem:[%s2128_s3 + $0xd8] sm:$0xff]  ;;  %v665_v43 = vld [vmem:[%s2128_s3 + $0x1c8] sm:$0xff] }
 0x117   :  { %v573_v49 = vadd.f32 %v1355_v47, %v249_v45  ;;  %v567_v50 = vpop.f32.mrb[31].mxu0  ;;  %1398 = vmatprep.subr.bf16.mxu0 %v1473_v20  ;;  %1450 = vmatprep.subr.bf16.mxu1 %v1473_v20  ;;  %v664_v45 = vld [vmem:[%s2128_s3 + $0x1c0] sm:$0xff]  ;;  %v667_v47 = vld [vmem:[%s2128_s3 + $0x1d8] sm:$0xff] }
 0x118   :  { %v1399_v51 = vpack.c.bf16 %v605_v44, %v604_v46  ;;  %v568_v52 = vadd.f32 %v567_v50, %v244_v48  ;;  %v634_v44 = vld [vmem:[%s2128_s3 + $0xd0] sm:$0xff]  ;;  %v637_v46 = vld [vmem:[%s2128_s3 + $0xe8] sm:$0xff]  ;;  %v636_v48 = vld [vmem:[%s2128_s3 + $0xe0] sm:$0xff] }
 0x119   :  { %v607_v53 = vmax.f32 %v573_v49, 0.0  ;;  %v666_v49 = vld [vmem:[%s2128_s3 + $0x1d0] sm:$0xff]  ;;  %v669_v50 = vld [vmem:[%s2128_s3 + $0x1e8] sm:$0xff] }
 0x11a   :  { %v606_v54 = vmax.f32 %v568_v52, 0.0  ;;  %1400 = vmatpush1.bf16.msra.mxu0 %v1399_v51  ;;  %1466 = vmatpush1.bf16.msra.mxu1 %v1399_v51  ;;  %v668_v51 = vld [vmem:[%s2128_s3 + $0x1e0] sm:$0xff]  ;;  %v671_v52 = vld [vmem:[%s2128_s3 + $0x1f8] sm:$0xff] }
 0x11b   :  { %1401 = vmatprep.subr.bf16.mxu0 %v1473_v20  ;;  %1451 = vmatprep.subr.bf16.mxu1 %v1473_v20  ;;  %v610_v20 = vld [vmem:[%s2128_s3 + $0x10] sm:$0xff] }
 0x11c   :  { %v1402_v55 = vpack.c.bf16 %v607_v53, %v606_v54  ;;  %v670_v53 = vld [vmem:[%s2128_s3 + $0x1f0] sm:$0xff]  ;;  %v1122_v54 = vld [vmem:[%s2129_s5 + $0x8] sm:$0xff] }
 0x11e   :  { %1403 = vmatpush1.bf16.msra.mxu0 %v1402_v55  ;;  %1467 = vmatpush1.bf16.msra.mxu1 %v1402_v55  ;;  %v792_v55 = vpop.permute.xlu1 %791 }
 0x121   :  { %929 = vmatmul.mubr.f32.vlgmr.msra.gmra.mrb[32].mxu0 %v608_v56  ;;  %1004 = vmatmul.mubr.f32.vlgmr.msra.gmra.mrb[0].mxu1 %v638_v57  ;;  %v787_v56 = vpop.permute.xlu0 %786 }
 0x122   :  { %933 = vmatprep.mubr.f32.mxu0 %v611_v58  ;;  %1008 = vmatprep.mubr.f32.mxu1 %v641_v59  ;;  %v712_v57 = vpop.permute.xlu1 %711 }
 0x125   :  { %934 = vmatmul.mubr.f32.gmra.mrb[34].mxu0 %v610_v20  ;;  %1009 = vmatmul.mubr.f32.gmra.mrb[2].mxu1 %v640_v60  ;;  %v707_v58 = vpop.permute.xlu0 %706 }
 0x126   :  { %938 = vmatprep.mubr.f32.mxu0 %v613_v61  ;;  %1013 = vmatprep.mubr.f32.mxu1 %v643_v62  ;;  %v802_v59 = vpop.permute.xlu1 %801 }
 0x129   :  { %939 = vmatmul.mubr.f32.gmra.mrb[36].mxu0 %v612_v63  ;;  %1014 = vmatmul.mubr.f32.gmra.mrb[4].mxu1 %v642_v0  ;;  %v797_v20 = vpop.permute.xlu0 %796 }
 0x12a   :  { %943 = vmatprep.mubr.f32.mxu0 %v615_v1  ;;  %1018 = vmatprep.mubr.f32.mxu1 %v645_v2  ;;  %v722_v60 = vpop.permute.xlu1 %721 }
 0x12d   :  { %944 = vmatmul.mubr.f32.gmra.mrb[38].mxu0 %v614_v3  ;;  %1019 = vmatmul.mubr.f32.gmra.mrb[6].mxu1 %v644_v4  ;;  %v717_v61 = vpop.permute.xlu0 %716 }
 0x12e   :  { %948 = vmatprep.mubr.f32.mxu0 %v617_v5  ;;  %1023 = vmatprep.mubr.f32.mxu1 %v647_v6  ;;  %v2069_v62 = vpop.permute.xlu1 %811 }
 0x131   :  { %949 = vmatmul.mubr.f32.gmra.mrb[40].mxu0 %v616_v7  ;;  %1024 = vmatmul.mubr.f32.gmra.mrb[8].mxu1 %v646_v8  ;;  %v2071_v63 = vpop.permute.xlu0 %806 }
 0x132   :  { %953 = vmatprep.mubr.f32.mxu0 %v619_v9  ;;  %1028 = vmatprep.mubr.f32.mxu1 %v649_v10  ;;  %v732_v0 = vpop.permute.xlu1 %731 }
 0x135   :  { %954 = vmatmul.mubr.f32.gmra.mrb[42].mxu0 %v618_v11  ;;  %1029 = vmatmul.mubr.f32.gmra.mrb[10].mxu1 %v648_v12  ;;  %v727_v1 = vpop.permute.xlu0 %726 }
 0x136   :  { %958 = vmatprep.mubr.f32.mxu0 %v621_v13  ;;  %1033 = vmatprep.mubr.f32.mxu1 %v651_v14  ;;  %v2073_v2 = vpop.permute.xlu1 %821 }
 0x139   :  { %959 = vmatmul.mubr.f32.gmra.mrb[44].mxu0 %v620_v15  ;;  %1034 = vmatmul.mubr.f32.gmra.mrb[12].mxu1 %v650_v16  ;;  %v2075_v3 = vpop.permute.xlu0 %816 }
 0x13a   :  { %963 = vmatprep.mubr.f32.mxu0 %v623_v17  ;;  %1038 = vmatprep.mubr.f32.mxu1 %v653_v18  ;;  %v2077_v4 = vpop.permute.xlu1 %741 }
 0x13d   :  { %964 = vmatmul.mubr.f32.gmra.mrb[46].mxu0 %v622_v19  ;;  %1039 = vmatmul.mubr.f32.gmra.mrb[14].mxu1 %v652_v21  ;;  %v2079_v5 = vpop.permute.xlu0 %736 }
 0x13e   :  { %968 = vmatprep.mubr.f32.mxu0 %v625_v22  ;;  %1043 = vmatprep.mubr.f32.mxu1 %v655_v23  ;;  %v2081_v6 = vpop.permute.xlu1 %831 }
 0x141   :  { %969 = vmatmul.mubr.f32.gmra.mrb[48].mxu0 %v624_v24  ;;  %1044 = vmatmul.mubr.f32.gmra.mrb[16].mxu1 %v654_v25  ;;  %v2083_v7 = vpop.permute.xlu0 %826 }
 0x142   :  { %973 = vmatprep.mubr.f32.mxu0 %v627_v26  ;;  %1048 = vmatprep.mubr.f32.mxu1 %v657_v27  ;;  %v2087_v18 = vpop.permute.xlu1 %751 }
 0x145   :  { %974 = vmatmul.mubr.f32.gmra.mrb[50].mxu0 %v626_v28  ;;  %1049 = vmatmul.mubr.f32.gmra.mrb[18].mxu1 %v656_v29  ;;  %v2089_v19 = vpop.permute.xlu0 %746 }
 0x146   :  { %978 = vmatprep.mubr.f32.mxu0 %v629_v30  ;;  %1053 = vmatprep.mubr.f32.mxu1 %v659_v31 }
 0x149   :  { %979 = vmatmul.mubr.f32.gmra.mrb[52].mxu0 %v628_v32  ;;  %1054 = vmatmul.mubr.f32.gmra.mrb[20].mxu1 %v658_v33 }
 0x14a   :  { %983 = vmatprep.mubr.f32.mxu0 %v631_v34  ;;  %1058 = vmatprep.mubr.f32.mxu1 %v661_v35 }
 0x14d   :  { %984 = vmatmul.mubr.f32.gmra.mrb[54].mxu0 %v630_v36  ;;  %1059 = vmatmul.mubr.f32.gmra.mrb[22].mxu1 %v660_v37 }
 0x14e   :  { %988 = vmatprep.mubr.f32.mxu0 %v633_v38  ;;  %1063 = vmatprep.mubr.f32.mxu1 %v663_v39  ;;  %v2091_v39 = vpop.permute.xlu1 %841 }
 0x151   :  { %989 = vmatmul.mubr.f32.gmra.mrb[56].mxu0 %v632_v40  ;;  %1064 = vmatmul.mubr.f32.gmra.mrb[24].mxu1 %v662_v41  ;;  %v2093_v40 = vpop.permute.xlu0 %836 }
 0x152   :  { %993 = vmatprep.mubr.f32.mxu0 %v635_v42  ;;  %1068 = vmatprep.mubr.f32.mxu1 %v665_v43 }
 0x155   :  { %994 = vmatmul.mubr.f32.gmra.mrb[58].mxu0 %v634_v44  ;;  %1069 = vmatmul.mubr.f32.gmra.mrb[26].mxu1 %v664_v45 }
 0x156   :  { %998 = vmatprep.mubr.f32.mxu0 %v637_v46  ;;  %1073 = vmatprep.mubr.f32.mxu1 %v667_v47 }
 0x159   :  { %999 = vmatmul.mubr.f32.gmra.mrb[60].mxu0 %v636_v48  ;;  %1074 = vmatmul.mubr.f32.gmra.mrb[28].mxu1 %v666_v49 }
 0x15a   :  { %1078 = vmatprep.mubr.f32.mxu1 %v669_v50  ;;  %1193 = vmatprep.mubr.f32.mxu0 %v1122_v54 }
 0x15d   :  { %1079 = vmatmul.mubr.f32.gmra.mrb[30].mxu1 %v668_v51 }
 0x15e   :  { %1083 = vmatprep.mubr.f32.mxu1 %v671_v52 }
 0x161   :  { %1084 = vmatmul.mubr.f32.gmra.mrb[32].mxu1 %v670_v53 }
 0x1f4   :  { %v930_v8 = vpop.f32.mrb[32].mxu0  ;;  %v2085_v9 = vpop.f32.mrb[0].mxu1 }
 0x1f5   :  { %v1007_v10 = vpop.f32.mrb[1].mxu1  ;;  %v932_v11 = vpop.f32.mrb[33].mxu0  ;;  %v931_v12 = vadd.f32 %v930_v8, %v707_v58 }
 0x1f7   :  { %v1089_v21 = vmax.f32 %v931_v12, 0.0 }
 0x1f8   :  { %v935_v13 = vpop.f32.mrb[34].mxu0  ;;  %v1010_v14 = vpop.f32.mrb[2].mxu1 }
 0x1f9   :  { %v936_v15 = vadd.f32 %v935_v13, %v712_v57  ;;  %v1012_v16 = vpop.f32.mrb[3].mxu1  ;;  %v937_v17 = vpop.f32.mrb[35].mxu0  ;;  %v1011_v23 = vadd.f32 %v1010_v14, %v787_v56 }
 0x1fb   :  { %v1090_v22 = vmax.f32 %v936_v15, 0.0  ;;  %v1105_v30 = vmax.f32 %v1011_v23, 0.0 }
 0x1fc   :  { %v940_v24 = vpop.f32.mrb[36].mxu0  ;;  %v1015_v25 = vpop.f32.mrb[4].mxu1 }
 0x1fd   :  { %v1406_v26 = vpack.c.bf16 %v1090_v22, %v1089_v21  ;;  %v1016_v27 = vadd.f32 %v1015_v25, %v792_v55  ;;  %v1017_v28 = vpop.f32.mrb[5].mxu1  ;;  %v942_v29 = vpop.f32.mrb[37].mxu0  ;;  %v941_v31 = vadd.f32 %v940_v24, %v717_v61 }
 0x1ff   :  { %v1106_v32 = vmax.f32 %v1016_v27, 0.0  ;;  %v1091_v41 = vmax.f32 %v941_v31, 0.0 }
 0x200   :  { %v945_v33 = vpop.f32.mrb[38].mxu0  ;;  %v1020_v34 = vpop.f32.mrb[6].mxu1 }
 0x201   :  { %v1404_v35 = vpack.c.bf16 %v1106_v32, %v1105_v30  ;;  %v946_v36 = vadd.f32 %v945_v33, %v722_v60  ;;  %v1022_v37 = vpop.f32.mrb[7].mxu1  ;;  %v947_v38 = vpop.f32.mrb[39].mxu0  ;;  %v1021_v43 = vadd.f32 %v1020_v34, %v797_v20 }
 0x202   :  { %v2095_v60 = vpop.permute.xlu1 %761  ;;  %v757_v20 = vpop.permute.xlu0 %756 }
 0x203   :  { %v1092_v42 = vmax.f32 %v946_v36, 0.0  ;;  %1405 = vmatprep.subr.bf16.mxu0 %v1404_v35  ;;  %v1107_v50 = vmax.f32 %v1021_v43, 0.0 }
 0x204   :  { %v950_v44 = vpop.f32.mrb[40].mxu0  ;;  %v1025_v45 = vpop.f32.mrb[8].mxu1  ;;  %1407 = vmatpush3.bf16.msra.mxu0 %v1406_v26 }
 0x205   :  { %v1410_v46 = vpack.c.bf16 %v1092_v42, %v1091_v41  ;;  %v1026_v47 = vadd.f32 %v1025_v45, %v802_v59  ;;  %v1027_v48 = vpop.f32.mrb[9].mxu1  ;;  %v952_v49 = vpop.f32.mrb[41].mxu0  ;;  %v951_v51 = vadd.f32 %v950_v44, %v727_v1 }
 0x206   :  { %v2101_v25 = vpop.permute.xlu1 %851  ;;  %v2103_v26 = vpop.permute.xlu0 %846 }
 0x207   :  { %v1108_v52 = vmax.f32 %v1026_v47, 0.0  ;;  %v1093_v61 = vmax.f32 %v951_v51, 0.0 }
 0x208   :  { %v955_v53 = vpop.f32.mrb[42].mxu0  ;;  %v1030_v54 = vpop.f32.mrb[10].mxu1 }
 0x209   :  { %v1408_v55 = vpack.c.bf16 %v1108_v52, %v1107_v50  ;;  %v956_v56 = vadd.f32 %v955_v53, %v732_v0  ;;  %v1032_v57 = vpop.f32.mrb[11].mxu1  ;;  %v957_v58 = vpop.f32.mrb[43].mxu0  ;;  %v1031_v10 = vadd.f32 %v1030_v54, %v2071_v63 }
 0x20a   :  { %v772_v43 = vpop.permute.xlu1 %771  ;;  %v767_v44 = vpop.permute.xlu0 %766 }
 0x20b   :  { %v1094_v8 = vmax.f32 %v956_v56, 0.0  ;;  %1409 = vmatprep.subr.bf16.mxu0 %v1408_v55  ;;  %v1109_v15 = vmax.f32 %v1031_v10, 0.0 }
 0x20c   :  { %v960_v59 = vpop.f32.mrb[44].mxu0  ;;  %v1035_v11 = vpop.f32.mrb[12].mxu1  ;;  %1411 = vmatpush3.bf16.msra.mxu0 %v1410_v46 }
 0x20d   :  { %v1414_v12 = vpack.c.bf16 %v1094_v8, %v1093_v61  ;;  %v1036_v1 = vadd.f32 %v1035_v11, %v2069_v62  ;;  %v1037_v13 = vpop.f32.mrb[13].mxu1  ;;  %v962_v14 = vpop.f32.mrb[45].mxu0  ;;  %v961_v0 = vadd.f32 %v960_v59, %v2079_v5 }
 0x20e   :  { %v857_v8 = vpop.permute.xlu0 %856 }
 0x20f   :  { %v1110_v16 = vmax.f32 %v1036_v1, 0.0  ;;  %v1095_v27 = vmax.f32 %v961_v0, 0.0 }
 0x210   :  { %v965_v17 = vpop.f32.mrb[46].mxu0  ;;  %v1040_v21 = vpop.f32.mrb[14].mxu1 }
 0x211   :  { %v1412_v22 = vpack.c.bf16 %v1110_v16, %v1109_v15  ;;  %v966_v23 = vadd.f32 %v965_v17, %v2077_v4  ;;  %v1042_v24 = vpop.f32.mrb[15].mxu1  ;;  %v967_v63 = vpop.f32.mrb[47].mxu0  ;;  %v1041_v62 = vadd.f32 %v1040_v21, %v2075_v3 }
 0x213   :  { %v1096_v28 = vmax.f32 %v966_v23, 0.0  ;;  %1413 = vmatprep.subr.bf16.mxu0 %v1412_v22  ;;  %v1111_v4 = vmax.f32 %v1041_v62, 0.0 }
 0x214   :  { %v970_v29 = vpop.f32.mrb[48].mxu0  ;;  %v1045_v30 = vpop.f32.mrb[16].mxu1  ;;  %1415 = vmatpush3.bf16.msra.mxu0 %v1414_v12 }
 0x215   :  { %v1418_v5 = vpack.c.bf16 %v1096_v28, %v1095_v27  ;;  %v1046_v31 = vadd.f32 %v1045_v30, %v2073_v2  ;;  %v1047_v32 = vpop.f32.mrb[17].mxu1  ;;  %v972_v33 = vpop.f32.mrb[49].mxu0  ;;  %v971_v34 = vadd.f32 %v970_v29, %v2089_v19 }
 0x217   :  { %v1112_v35 = vmax.f32 %v1046_v31, 0.0  ;;  %v1097_v45 = vmax.f32 %v971_v34, 0.0 }
 0x218   :  { %v975_v36 = vpop.f32.mrb[50].mxu0  ;;  %v1050_v37 = vpop.f32.mrb[18].mxu1 }
 0x219   :  { %v1416_v38 = vpack.c.bf16 %v1112_v35, %v1111_v4  ;;  %v976_v41 = vadd.f32 %v975_v36, %v2087_v18  ;;  %v1052_v42 = vpop.f32.mrb[19].mxu1  ;;  %v977_v3 = vpop.f32.mrb[51].mxu0  ;;  %v1051_v47 = vadd.f32 %v1050_v37, %v2083_v7 }
 0x21a   :  { %v862_v7 = vpop.permute.xlu1 %861 }
 0x21b   :  { %v1098_v46 = vmax.f32 %v976_v41, 0.0  ;;  %1417 = vmatprep.subr.bf16.mxu0 %v1416_v38  ;;  %v1113_v52 = vmax.f32 %v1051_v47, 0.0 }
 0x21c   :  { %v980_v2 = vpop.f32.mrb[52].mxu0  ;;  %v1055_v48 = vpop.f32.mrb[20].mxu1  ;;  %1419 = vmatpush3.bf16.msra.mxu0 %v1418_v5 }
 0x21d   :  { %v1422_v49 = vpack.c.bf16 %v1098_v46, %v1097_v45  ;;  %v1056_v19 = vadd.f32 %v1055_v48, %v2081_v6  ;;  %v1057_v50 = vpop.f32.mrb[21].mxu1  ;;  %v982_v51 = vpop.f32.mrb[53].mxu0  ;;  %v981_v53 = vadd.f32 %v980_v2, %v757_v20 }
 0x21e   :  { %v782_v63 = vpop.permute.xlu1 %781 }
 0x21f   :  { %v1114_v18 = vmax.f32 %v1056_v19, 0.0  ;;  %v1099_v10 = vmax.f32 %v981_v53, 0.0  ;;  %v1006_v27 = vadd.f32 %v2085_v9, %v782_v63 }
 0x220   :  { %v985_v54 = vpop.f32.mrb[54].mxu0  ;;  %v1060_v55 = vpop.f32.mrb[22].mxu1 }
 0x221   :  { %v1420_v56 = vpack.c.bf16 %v1114_v18, %v1113_v52  ;;  %v986_v57 = vadd.f32 %v985_v54, %v2095_v60  ;;  %v1062_v58 = vpop.f32.mrb[23].mxu1  ;;  %v987_v61 = vpop.f32.mrb[55].mxu0  ;;  %v1061_v11 = vadd.f32 %v1060_v55, %v2093_v40  ;;  %v1104_v34 = vmax.f32 %v1006_v27, 0.0 }
 0x222   :  { %v777_v40 = vpop.permute.xlu0 %776 }
 0x223   :  { %v1100_v59 = vmax.f32 %v986_v57, 0.0  ;;  %1421 = vmatprep.subr.bf16.mxu0 %v1420_v56  ;;  %v1115_v15 = vmax.f32 %v1061_v11, 0.0 }
 0x224   :  { %v990_v6 = vpop.f32.mrb[56].mxu0  ;;  %v1065_v12 = vpop.f32.mrb[24].mxu1  ;;  %1423 = vmatpush3.bf16.msra.mxu0 %v1422_v49 }
 0x225   :  { %v1426_v1 = vpack.c.bf16 %v1100_v59, %v1099_v10  ;;  %v1066_v20 = vadd.f32 %v1065_v12, %v2091_v39  ;;  %v1067_v13 = vpop.f32.mrb[25].mxu1  ;;  %v992_v14 = vpop.f32.mrb[57].mxu0  ;;  %v991_v0 = vadd.f32 %v990_v6, %v767_v44 }
 0x226   :  { %v1127_v19 = vpop.permute.xlu0 %1126 }
 0x227   :  { %v1116_v60 = vmax.f32 %v1066_v20, 0.0  ;;  %v1101_v28 = vmax.f32 %v991_v0, 0.0 }
 0x228   :  { %v995_v16 = vpop.f32.mrb[58].mxu0  ;;  %v1070_v17 = vpop.f32.mrb[26].mxu1 }
 0x229   :  { %v1424_v21 = vpack.c.bf16 %v1116_v60, %v1115_v15  ;;  %v996_v22 = vadd.f32 %v995_v16, %v772_v43  ;;  %v1072_v23 = vpop.f32.mrb[27].mxu1  ;;  %v997_v24 = vpop.f32.mrb[59].mxu0  ;;  %v1071_v29 = vadd.f32 %v1070_v17, %v2103_v26 }
 0x22b   :  { %v1102_v62 = vmax.f32 %v996_v22, 0.0  ;;  %1425 = vmatprep.subr.bf16.mxu0 %v1424_v21  ;;  %v1117_v35 = vmax.f32 %v1071_v29, 0.0 }
 0x22c   :  { %v1000_v39 = vpop.f32.mrb[60].mxu0  ;;  %v1075_v30 = vpop.f32.mrb[28].mxu1  ;;  %1427 = vmatpush3.bf16.msra.mxu0 %v1426_v1 }
 0x22d   :  { %v1430_v5 = vpack.c.bf16 %v1102_v62, %v1101_v28  ;;  %v1001_v31 = vadd.f32 %v1000_v39, %v777_v40  ;;  %v1076_v32 = vadd.f32 %v1075_v30, %v2101_v25  ;;  %v1077_v33 = vpop.f32.mrb[29].mxu1  ;;  %v1002_v4 = vpop.f32.mrb[61].mxu0  ;;  %v1121_v25 = vld [vmem:[%s2129_s5] sm:$0xff] }
 0x22f   :  { %v1103_v36 = vmax.f32 %v1001_v31, 0.0  ;;  %v1118_v37 = vmax.f32 %v1076_v32, 0.0 }
 0x230   :  { %v1080_v38 = vpop.f32.mrb[30].mxu1 }
 0x231   :  { %v1434_v9 = vpack.c.bf16 %v1104_v34, %v1103_v36  ;;  %v1428_v41 = vpack.c.bf16 %v1118_v37, %v1117_v35  ;;  %v1082_v42 = vpop.f32.mrb[31].mxu1  ;;  %v1081_v3 = vadd.f32 %v1080_v38, %v857_v8 }
 0x233   :  { %1429 = vmatprep.subr.bf16.mxu0 %v1428_v41  ;;  %v1119_v45 = vmax.f32 %v1081_v3, 0.0 }
 0x234   :  { %v1085_v26 = vpop.f32.mrb[32].mxu1  ;;  %1431 = vmatpush3.bf16.msra.mxu0 %v1430_v5 }
 0x235   :  { %v1086_v43 = vadd.f32 %v1085_v26, %v862_v7  ;;  %v1087_v44 = vpop.f32.mrb[33].mxu1 }
 0x237   :  { %v1120_v46 = vmax.f32 %v1086_v43, 0.0 }
 0x239   :  { %v1432_v47 = vpack.c.bf16 %v1120_v46, %v1119_v45 }
 0x23b   :  { %1433 = vmatprep.subr.bf16.mxu0 %v1432_v47 }
 0x23c   :  { %1435 = vmatpush3.bf16.msra.mxu0 %v1434_v9 }
 0x23f   :  { %1194 = vmatmul.mubr.f32.vlgmr.msra.gmra.mrb[62].mxu0 %v1121_v25 }
 0x312   :  { %v1303_v2 = vpop.f32.mrb[62].mxu0 }
 0x313   :  { %v1304_v48 = vpop.f32.mrb[63].mxu0 }
 0x314   :  { %v1305_v49 = vadd.f32 %v1304_v48, %v1303_v2 }
 0x316   :  { %v1196_v50 = vadd.f32 %v1305_v49, %v1127_v19 }
 0x318   :  { %1200 = vst.msk [vmem:[%s2130_s7] sm:$0xff] %vm1199_vm1, %v1196_v50 }

</bundles_post_ra>
